<compile_context>
chip_gen: v7x
topology: tpu7x:2x2x1
jax: 0.10.0
libtpu: 0.0.40
codegen_flags: <defaults>
</compile_context>

<pallas_src>
import functools

import jax
import jax.numpy as jnp
from jax.experimental import pallas as pl
from jax.experimental.pallas import tpu as pltpu

LANE = 128  # TPU lane width; the (flattened) batch axis is laid out along lanes.


def _fused_mlp_bce_kernel(xT_ref, y_ref, w1_ref, b1_ref, w2_ref, b2_ref,
                          probs_ref, bce_ref):
    """One grid step == one lane-axis chunk of the whole epoch.

    xT_ref   : (F, TL)  features, batch on the lane axis, bf16 (MXU operand)
    y_ref    : (1, TL)  labels in {0, 1}, f32
    w1_ref   : (H, F)   layer-1 weight (PyTorch (out,in) layout), bf16 — VMEM-resident
    b1_ref   : (H, 1)   layer-1 bias, f32                              — VMEM-resident
    w2_ref   : (H, 1)   layer-2 weight (stored transposed), f32        — VMEM-resident
    b2_ref   : (1, 1)   layer-2 bias, f32                              — SMEM scalar
    probs_ref: (1, TL)  sigmoid probabilities (lane-dense, unmasked stores)
    bce_ref  : (1, TL)  per-element BCE (lane-dense); per-batch means taken in JAX
    """
    xT = xT_ref[...]                                   # (F, TL) bf16
    y = y_ref[...]                                     # (1, TL) f32

    # Layer 1 on the MXU: bf16 operands, f32 accumulation; batch stays on lanes.
    h = jnp.dot(w1_ref[...], xT, preferred_element_type=jnp.float32) + b1_ref[...]
    h = jnp.maximum(h, 0.0)                            # ReLU, (H, TL), f32

    # Layer 2 (H -> 1): VPU multiply + sublane (XLU) reduce — avoids a wasteful
    # 1-output-column MXU matmul.
    z = jnp.sum(h * w2_ref[...], axis=0, keepdims=True) + b2_ref[0, 0]  # (1, TL) logits
    p = jax.nn.sigmoid(z)                              # EUP
    probs_ref[...] = p                                 # unmasked lane-dense store

    # Per-element BCE from logits (numerically stable softplus form):
    #   -(y log p + (1-y) log(1-p)) == max(z, 0) - z*y + log1p(exp(-|z|))
    bce_ref[...] = jnp.maximum(z, 0.0) - z * y + jnp.log1p(jnp.exp(-jnp.abs(z)))


@functools.partial(jax.jit, static_argnames=("batch_size", "lane_tile"))
def tabular_forward_epoch(xT, y, w1, b1, w2, b2, *, batch_size, lane_tile):
    """Forward + BCE + correct-count for a whole epoch in (at most a few) kernel steps.

    xT : (F, TOTAL) bf16 feature matrix (batch on the lane axis), TOTAL = N * B.
    y  : (1, TOTAL) f32 labels in {0, 1}.
    Returns (probs (1, TOTAL), per-mini-batch mean BCE (N,), total correct count ()).
    """
    F, total = xT.shape
    H = w1.shape[0]
    assert total % lane_tile == 0 and lane_tile % LANE == 0
    assert total % batch_size == 0
    n_tiles = total // lane_tile

    probs, bce = pl.pallas_call(
        _fused_mlp_bce_kernel,
        out_shape=(
            jax.ShapeDtypeStruct((1, total), jnp.float32),   # probabilities
            jax.ShapeDtypeStruct((1, total), jnp.float32),   # per-element BCE
        ),
        grid=(n_tiles,),
        in_specs=[
            pl.BlockSpec((F, lane_tile), lambda i: (0, i)),  # features: streamed per chunk
            pl.BlockSpec((1, lane_tile), lambda i: (0, i)),  # labels:   streamed per chunk
            pl.BlockSpec((H, F), lambda i: (0, 0)),          # w1: VMEM-resident across grid
            pl.BlockSpec((H, 1), lambda i: (0, 0)),          # b1: resident
            pl.BlockSpec((H, 1), lambda i: (0, 0)),          # w2: resident
            pl.BlockSpec(memory_space=pltpu.MemorySpace.SMEM),  # b2: scalar in SMEM
        ],
        out_specs=(
            pl.BlockSpec((1, lane_tile), lambda i: (0, i)),
            pl.BlockSpec((1, lane_tile), lambda i: (0, i)),
        ),
        compiler_params=pltpu.CompilerParams(
            # Tiny (usually 1-step) grid: nothing worth sharding across TCs.
            dimension_semantics=("arbitrary",)),
    )(xT, y, w1, b1, w2, b2)

    # Cheap cross-op reductions in JAX (hundreds of elements — free vs. dispatch).
    n_batches = total // batch_size
    per_batch_loss = bce.reshape(n_batches, batch_size).mean(axis=1)  # nn.BCELoss 'mean'
    predicted = (probs > 0.5).astype(jnp.float32)                     # compute_loss()
    correct = jnp.sum((predicted == y).astype(jnp.float32))
    return probs, per_batch_loss, correct


def init_params(key, in_features, hidden):
    """PyTorch nn.Linear init: U(-1/sqrt(fan_in), +1/sqrt(fan_in)), (out, in) layout."""
    k1, k2, k3, k4 = jax.random.split(key, 4)
    lim1 = 1.0 / jnp.sqrt(jnp.float32(in_features))
    lim2 = 1.0 / jnp.sqrt(jnp.float32(hidden))
    w1 = jax.random.uniform(k1, (hidden, in_features), jnp.float32, -lim1, lim1)
    b1 = jax.random.uniform(k2, (hidden, 1), jnp.float32, -lim1, lim1)
    w2 = jax.random.uniform(k3, (hidden, 1), jnp.float32, -lim2, lim2)  # (1,H) weight, transposed
    b2 = jax.random.uniform(k4, (1, 1), jnp.float32, -lim2, lim2)
    return w1, b1, w2, b2


if __name__ == "__main__":
    key = jax.random.PRNGKey(0)

    # Heart-disease-style tabular data: 13 feature columns, hidden width 32.
    # One mini-batch == 128 rows; 4 mini-batches per epoch; 2 epochs.
    NUM_BATCHES, BATCH, FEATURES, HIDDEN, EPOCHS = 4, 128, 13, 32, 2
    TOTAL = NUM_BATCHES * BATCH

    k_data, k_lbl, k_par = jax.random.split(key, 3)
    w1, b1, w2, b2 = init_params(k_par, FEATURES, HIDDEN)

    # Synthetic "train_loader": stacked (features, labels) mini-batches.
    feats = jax.random.normal(k_data, (NUM_BATCHES, BATCH, FEATURES), jnp.float32)
    labels = (jax.random.uniform(k_lbl, (NUM_BATCHES, BATCH, 1)) > 0.5).astype(jnp.float32)

    # Layout plumbing + MXU-operand cast hoisted OUT of the epoch loop (done once):
    # batch on the lane axis, features/w1 in bf16, everything else stays f32.
    xT = jnp.transpose(feats, (2, 0, 1)).reshape(FEATURES, TOTAL).astype(jnp.bfloat16)
    y = labels.reshape(1, TOTAL)
    w1_mxu = w1.astype(jnp.bfloat16)

    # Whole epoch in one grid step when it fits comfortably in VMEM; otherwise
    # 8K-lane chunks (~0.2 MB bf16 feature block) still reach ~85% of HBM roofline
    # and stay within the v7x 64 MiB VMEM ceiling with double-buffer headroom.
    LANE_TILE = TOTAL if TOTAL <= 8192 else 8192
    assert TOTAL % LANE_TILE == 0

    # TODO(synk): loss.backward(), Adam optimizer.step() and torch.save() are
    #             training-state side effects with no clean Pallas equivalent;
    #             only the forward / loss / accuracy hot path is implemented,
    #             so every epoch reuses the same parameters.
    probs_row = epoch_loss = accuracy = None
    for _epoch in range(EPOCHS):
        probs_row, per_batch_loss, correct = tabular_forward_epoch(
            xT, y, w1_mxu, b1, w2, b2, batch_size=BATCH, lane_tile=LANE_TILE)
        epoch_loss = jnp.mean(per_batch_loss)      # running_loss / len(train_loader)
        accuracy = correct / TOTAL                 # compute_loss() test accuracy

    probs = probs_row.reshape(NUM_BATCHES, BATCH, 1)
    probs, epoch_loss, accuracy = jax.block_until_ready((probs, epoch_loss, accuracy))

    # Sanity checks against a pure-JAX f32 reference of the forward pass.
    h_ref = jnp.maximum(jnp.einsum('nbf,hf->nbh', feats, w1) + b1[:, 0], 0.0)
    z_ref = jnp.einsum('nbh,h->nb', h_ref, w2[:, 0]) + b2[0, 0]
    p_ref = jax.nn.sigmoid(z_ref)[..., None]
    assert probs.shape == (NUM_BATCHES, BATCH, 1)
    assert jnp.allclose(probs, p_ref, atol=2e-2)   # bf16 MXU operands over a 13-deep contraction
    assert bool(jnp.isfinite(epoch_loss))
    assert 0.0 <= float(accuracy) <= 1.0
    print("KERNEL_OK")
</pallas_src>

<mosaic_0001>
module attributes {stable_mosaic.version = 11 : i64} {
  func.func @_fused_mlp_bce_kernel(%arg0: i32, %arg1: memref<13x512xbf16, #tpu.memory_space<vmem>>, %arg2: memref<1x512xf32, #tpu.memory_space<vmem>>, %arg3: memref<32x13xbf16, #tpu.memory_space<vmem>>, %arg4: memref<32x1xf32, #tpu.memory_space<vmem>>, %arg5: memref<32x1xf32, #tpu.memory_space<vmem>>, %arg6: memref<1x1xf32, #tpu.memory_space<smem>>, %arg7: memref<1x512xf32, #tpu.memory_space<vmem>>, %arg8: memref<1x512xf32, #tpu.memory_space<vmem>>) attributes {dimension_semantics = [#tpu.dimension_semantics<arbitrary>], iteration_bounds = array<i64: 1>, scalar_prefetch = 0 : i64, scratch_operands = 0 : i64, tpu.core_type = #tpu.core_type<tc>, window_params = [{transform_indices = @transform_0, window_bounds = array<i64: 13, 512>}, {transform_indices = @transform_1, window_bounds = array<i64: 1, 512>}, {pipeline_mode = #tpu.pipeline_mode<synchronous>, transform_indices = @transform_2, window_bounds = array<i64: 32, 13>}, {pipeline_mode = #tpu.pipeline_mode<synchronous>, transform_indices = @transform_3, window_bounds = array<i64: 32, 1>}, {pipeline_mode = #tpu.pipeline_mode<synchronous>, transform_indices = @transform_4, window_bounds = array<i64: 32, 1>}, {transform_indices = @transform_5, window_bounds = array<i64: 1, 1>}, {transform_indices = @transform_6, window_bounds = array<i64: 1, 512>}, {transform_indices = @transform_7, window_bounds = array<i64: 1, 512>}]} {
    %c0 = arith.constant 0 : index
    %c0_0 = arith.constant 0 : index
    %0 = vector.load %arg1[%c0, %c0_0] : memref<13x512xbf16, #tpu.memory_space<vmem>>, vector<13x512xbf16>
    %c0_1 = arith.constant 0 : index
    %c0_2 = arith.constant 0 : index
    %1 = vector.load %arg2[%c0_1, %c0_2] : memref<1x512xf32, #tpu.memory_space<vmem>>, vector<1x512xf32>
    %c0_3 = arith.constant 0 : index
    %c0_4 = arith.constant 0 : index
    %2 = vector.load %arg3[%c0_3, %c0_4] : memref<32x13xbf16, #tpu.memory_space<vmem>>, vector<32x13xbf16>
    %cst = arith.constant dense<0.000000e+00> : vector<32x512xf32>
    %3 = tpu.matmul %2, %0, %cst {dimension_numbers = #tpu.dot_dimension_numbers<[1], [0], [0], [1], [0, 0, 1, 1], [], []>} : vector<32x13xbf16>, vector<13x512xbf16>, vector<32x512xf32> -> vector<32x512xf32>
    %c0_5 = arith.constant 0 : index
    %c0_6 = arith.constant 0 : index
    %4 = vector.load %arg4[%c0_5, %c0_6] : memref<32x1xf32, #tpu.memory_space<vmem>>, vector<32x1xf32>
    %5 = vector.broadcast %4 : vector<32x1xf32> to vector<32x512xf32>
    %6 = arith.addf %3, %5 : vector<32x512xf32>
    %cst_7 = arith.constant 0.000000e+00 : f32
    %7 = vector.broadcast %cst_7 : f32 to vector<32x512xf32>
    %8 = arith.maximumf %6, %7 : vector<32x512xf32>
    %c0_8 = arith.constant 0 : index
    %c0_9 = arith.constant 0 : index
    %9 = vector.load %arg5[%c0_8, %c0_9] : memref<32x1xf32, #tpu.memory_space<vmem>>, vector<32x1xf32>
    %10 = vector.broadcast %9 : vector<32x1xf32> to vector<32x512xf32>
    %11 = arith.mulf %8, %10 : vector<32x512xf32>
    %cst_10 = arith.constant dense<0.000000e+00> : vector<512xf32>
    %12 = vector.multi_reduction <add>, %11, %cst_10 [0] : vector<32x512xf32> to vector<512xf32>
    %13 = vector.shape_cast %12 : vector<512xf32> to vector<1x512xf32>
    %c0_11 = arith.constant 0 : index
    %c0_12 = arith.constant 0 : index
    %14 = memref.load %arg6[%c0_11, %c0_12] : memref<1x1xf32, #tpu.memory_space<smem>>
    %15 = vector.broadcast %14 : f32 to vector<1x512xf32>
    %16 = arith.addf %13, %15 : vector<1x512xf32>
    %17 = arith.negf %16 : vector<1x512xf32>
    %18 = math.exp %17 : vector<1x512xf32>
    %cst_13 = arith.constant 1.000000e+00 : f32
    %19 = vector.broadcast %cst_13 : f32 to vector<1x512xf32>
    %20 = arith.addf %19, %18 : vector<1x512xf32>
    %21 = arith.divf %19, %20 : vector<1x512xf32>
    %c0_14 = arith.constant 0 : index
    %c0_15 = arith.constant 0 : index
    %22 = vector.load %arg7[%c0_14, %c0_15] : memref<1x512xf32, #tpu.memory_space<vmem>>, vector<1x512xf32>
    tpu.vector_store %arg7[%c0_14, %c0_15], %21 {strides = array<i32>} : memref<1x512xf32, #tpu.memory_space<vmem>>, vector<1x512xf32>,
    %cst_16 = arith.constant 0.000000e+00 : f32
    %23 = vector.broadcast %cst_16 : f32 to vector<1x512xf32>
    %24 = arith.maximumf %16, %23 : vector<1x512xf32>
    %25 = arith.mulf %16, %1 : vector<1x512xf32>
    %26 = arith.subf %24, %25 : vector<1x512xf32>
    %27 = math.absf %16 : vector<1x512xf32>
    %cst_17 = arith.constant 0.000000e+00 : f32
    %28 = vector.broadcast %cst_17 : f32 to vector<1x512xf32>
    %29 = arith.subf %28, %27 : vector<1x512xf32>
    %30 = math.exp %29 : vector<1x512xf32>
    %31 = math.log1p %30 : vector<1x512xf32>
    %32 = arith.addf %26, %31 : vector<1x512xf32>
    %c0_18 = arith.constant 0 : index
    %c0_19 = arith.constant 0 : index
    %33 = vector.load %arg8[%c0_18, %c0_19] : memref<1x512xf32, #tpu.memory_space<vmem>>, vector<1x512xf32>
    tpu.vector_store %arg8[%c0_18, %c0_19], %32 {strides = array<i32>} : memref<1x512xf32, #tpu.memory_space<vmem>>, vector<1x512xf32>,
    return
  }
  func.func @transform_0(%arg0: i32) -> (i32, i32) {
    %c0_i32 = arith.constant 0 : i32
    %c0_i32_0 = arith.constant 0 : i32
    return %c0_i32, %arg0 : i32, i32
  }
  func.func @transform_1(%arg0: i32) -> (i32, i32) {
    %c0_i32 = arith.constant 0 : i32
    %c0_i32_0 = arith.constant 0 : i32
    return %c0_i32, %arg0 : i32, i32
  }
  func.func @transform_2(%arg0: i32) -> (i32, i32) {
    %c0_i32 = arith.constant 0 : i32
    %c0_i32_0 = arith.constant 0 : i32
    %c0_i32_1 = arith.constant 0 : i32
    return %c0_i32, %c0_i32_0 : i32, i32
  }
  func.func @transform_3(%arg0: i32) -> (i32, i32) {
    %c0_i32 = arith.constant 0 : i32
    %c0_i32_0 = arith.constant 0 : i32
    %c0_i32_1 = arith.constant 0 : i32
    return %c0_i32, %c0_i32_0 : i32, i32
  }
  func.func @transform_4(%arg0: i32) -> (i32, i32) {
    %c0_i32 = arith.constant 0 : i32
    %c0_i32_0 = arith.constant 0 : i32
    %c0_i32_1 = arith.constant 0 : i32
    return %c0_i32, %c0_i32_0 : i32, i32
  }
  func.func @transform_5(%arg0: i32) -> (i32, i32) {
    %c0_i32 = arith.constant 0 : i32
    %c0_i32_0 = arith.constant 0 : i32
    %c0_i32_1 = arith.constant 0 : i32
    return %c0_i32, %c0_i32_0 : i32, i32
  }
  func.func @transform_6(%arg0: i32) -> (i32, i32) {
    %c0_i32 = arith.constant 0 : i32
    %c0_i32_0 = arith.constant 0 : i32
    return %c0_i32, %arg0 : i32, i32
  }
  func.func @transform_7(%arg0: i32) -> (i32, i32) {
    %c0_i32 = arith.constant 0 : i32
    %c0_i32_0 = arith.constant 0 : i32
    return %c0_i32, %arg0 : i32, i32
  }
}

</mosaic_0001>

<bundles_post_ra>
// kernel: tabular_forward_epoch.1
= control target key start
LH: loop header
LB: loop body
LE: loop exit
PB: predicated region body
PF: predicated region fallthrough
CT: control target
= control target key end

     0   :  { %vm93_vm0 = vcmask 1045504   ;;  %vm94_vm1 = vcmask 1046528   ;;  %v557_v1 = vmov 0   ;;  %v558_v2 = vmov 65535   ;;  %s708_s0 = inlined_call_operand.vmem [shape: bf16[13,512], index: 0, kind: input, shape index: {}]   ;;  %s709_s2 = inlined_call_operand.vmem [shape: bf16[32,13], index: 2, kind: input, shape index: {}]   ;;  %s710_s3 = inlined_call_operand.vmem [shape: f32[32,1], index: 3, kind: input, shape index: {}]   ;;  %s711_s4 = inlined_call_operand.vmem [shape: f32[32,1], index: 4, kind: input, shape index: {}]   ;;  %s712_s5 = inlined_call_operand.<no memory space> [shape: f32[1,1], index: 5, kind: input, shape index: {}]   ;;  %s713_s1 = inlined_call_operand.vmem [shape: f32[1,512], index: 1, kind: input, shape index: {}]   ;;  %s714_s6 = inlined_call_operand.vmem [shape: f32[1,512], index: 6, kind: output, shape index: {0}]   ;;  %s715_s7 = inlined_call_operand.vmem [shape: f32[1,512], index: 7, kind: output, shape index: {1}]  }
   0x1   :  { %v517_v0 = vld [vmem:[%s708_s0 + $0x4] ss:$16 sps:$4 sm:$0x7f]   ;;  %141 = vmatprep.mubr.bf16.mxu0 %v557_v1  ;;  %194 = vmatprep.mubr.bf16.mxu1 %v557_v1  ;;  %v95_v3 = vsel %vm93_vm0, 4294967295, %v558_v2  ;;  %vm86_vm2 = vcmask 105472   ;;  %v37_v15 = vld [vmem:[%s710_s3 + $0x8] sm:$0xff] }
   0x2   :  { %515 = vset.pattern.permute.xlu0 %v557_v1  ;;  %516 = vset.pattern.permute.xlu1 %v557_v1  ;;  %v96_v4 = vsel %vm94_vm1, %v95_v3, 0  ;;  %v519_v5 = vld [vmem:[%s708_s0 + $0xc] ss:$16 sps:$4 sm:$0x7f]   ;;  %v36_v12 = vld [vmem:[%s710_s3] sm:$0xff]  ;;  %v38_v13 = vld [vmem:[%s710_s3 + $0x10] sm:$0xff] }
   0x3   :  { %v101_v6 = vand.u32 %v517_v0, %v96_v4  ;;  %v521_v7 = vld [vmem:[%s708_s0] ss:$16 sps:$4 sm:$0x7f]   ;;  %v522_v8 = vld [vmem:[%s708_s0 + $0x8] ss:$16 sps:$4 sm:$0x7f]   ;;  %v107_v9 = vand.u32 %v519_v5, %v96_v4  ;;  %42 = vperm.xlu0 %515, %v36_v12   ;;  %52 = vperm.xlu1 %516, %v38_v13  }
   0x4   :  { %v98_v10 = vand.u32 %v521_v7, %v96_v4  ;;  %v104_v11 = vand.u32 %v522_v8, %v96_v4  ;;  %v523_v14 = vld [vmem:[%s709_s2] sm:$0xff]   ;;  %v39_v16 = vld [vmem:[%s710_s3 + $0x18] sm:$0xff]  ;;  %v232_v18 = vld [vmem:[%s711_s4 + $0x8] sm:$0xff] }
   0x5   :  { %109 = vmatprep.subr.bf16.mxu0 %v101_v6  ;;  %162 = vmatprep.subr.bf16.mxu1 %v107_v9  ;;  %v231_v17 = vld [vmem:[%s711_s4] sm:$0xff]  ;;  %v524_v19 = vld [vmem:[%s709_s2 + $0x8] sm:$0xff]   ;;  %v233_v20 = vld [vmem:[%s711_s4 + $0x10] sm:$0xff] }
   0x6   :  { %110 = vmatpush1.bf16.msra.mxu0 %v98_v10  ;;  %163 = vmatpush1.bf16.msra.mxu1 %v104_v11  ;;  %v234_v21 = vld [vmem:[%s711_s4 + $0x18] sm:$0xff] }
   0x7   :  { %47 = vperm.xlu0 %515, %v37_v15   ;;  %57 = vperm.xlu1 %516, %v39_v16  }
   0x9   :  { %504 = vmatmul.mubr.msk.bf16.vlgmr.msra.gmra.mrb[0].mxu0 %vm86_vm2, %v523_v14  ;;  %506 = vmatmul.mubr.msk.bf16.vlgmr.msra.gmra.mrb[0].mxu1 %vm86_vm2, %v523_v14 }
   0xa   :  { %151 = vmatprep.mubr.bf16.mxu0 %v557_v1  ;;  %204 = vmatprep.mubr.bf16.mxu1 %v557_v1 }
   0xb   :  { %237 = vperm.xlu0 %515, %v231_v17   ;;  %242 = vperm.xlu1 %516, %v232_v18  }
   0xf   :  { %247 = vperm.xlu0 %515, %v233_v20   ;;  %252 = vperm.xlu1 %516, %v234_v21  }
  0x11   :  { %505 = vmatmul.mubr.msk.bf16.gmra.mrb[4].mxu0 %vm86_vm2, %v524_v19  ;;  %507 = vmatmul.mubr.msk.bf16.gmra.mrb[4].mxu1 %vm86_vm2, %v524_v19 }
  0x82   :  { %v43_v22 = vpop.permute.xlu0 %42  ;;  %v53_v23 = vpop.permute.xlu1 %52 }
  0x86   :  { %v48_v24 = vpop.permute.xlu0 %47  ;;  %v58_v25 = vpop.permute.xlu1 %57 }
  0x8a   :  { %v238_v48 = vpop.permute.xlu0 %237  ;;  %v243_v49 = vpop.permute.xlu1 %242 }
  0x8e   :  { %v248_v16 = vpop.permute.xlu0 %247 }
  0xdc   :  { %v143_v26 = vpop.f32.mrb[0].mxu0  ;;  %v196_v27 = vpop.f32.mrb[0].mxu1 }
  0xdd   :  { %v144_v28 = vadd.f32 %v143_v26, %v43_v22  ;;  %v197_v29 = vadd.f32 %v196_v27, %v43_v22  ;;  %v145_v30 = vpop.f32.mrb[1].mxu0  ;;  %v198_v31 = vpop.f32.mrb[1].mxu1 }
  0xde   :  { %v146_v32 = vadd.f32 %v145_v30, %v43_v22  ;;  %v199_v33 = vadd.f32 %v198_v31, %v43_v22  ;;  %v147_v34 = vpop.f32.mrb[2].mxu0  ;;  %v200_v35 = vpop.f32.mrb[2].mxu1 }
  0xdf   :  { %v215_v36 = vmax.f32 %v144_v28, 0.0  ;;  %v217_v37 = vmax.f32 %v197_v29, 0.0  ;;  %v148_v38 = vadd.f32 %v147_v34, %v48_v24  ;;  %v201_v39 = vadd.f32 %v200_v35, %v48_v24  ;;  %v149_v40 = vpop.f32.mrb[3].mxu0  ;;  %v202_v41 = vpop.f32.mrb[3].mxu1 }
  0xe0   :  { %v216_v42 = vmax.f32 %v146_v32, 0.0  ;;  %v218_v43 = vmax.f32 %v199_v33, 0.0  ;;  %v150_v44 = vadd.f32 %v149_v40, %v48_v24  ;;  %v203_v45 = vadd.f32 %v202_v41, %v48_v24  ;;  %v253_v27 = vpop.permute.xlu1 %252 }
  0xe1   :  { %v219_v46 = vmax.f32 %v148_v38, 0.0  ;;  %v221_v47 = vmax.f32 %v201_v39, 0.0  ;;  %v255_v52 = vmul.f32 %v238_v48, %v215_v36  ;;  %v257_v53 = vmul.f32 %v238_v48, %v217_v37 }
  0xe2   :  { %v220_v50 = vmax.f32 %v150_v44, 0.0  ;;  %v222_v51 = vmax.f32 %v203_v45, 0.0  ;;  %v256_v56 = vmul.f32 %v238_v48, %v216_v42  ;;  %v258_v57 = vmul.f32 %v238_v48, %v218_v43 }
  0xe3   :  { %v259_v54 = vmul.f32 %v243_v49, %v219_v46  ;;  %v261_v55 = vmul.f32 %v243_v49, %v221_v47 }
  0xe4   :  { %v260_v58 = vmul.f32 %v243_v49, %v220_v50  ;;  %v262_v59 = vmul.f32 %v243_v49, %v222_v51  ;;  %v153_v60 = vpop.f32.mrb[4].mxu0  ;;  %v206_v61 = vpop.f32.mrb[4].mxu1 }
  0xe5   :  { %v271_v62 = vadd.f32 %v259_v54, %v255_v52  ;;  %v289_v63 = vadd.f32 %v261_v55, %v257_v53  ;;  %v154_v0 = vadd.f32 %v153_v60, %v53_v23  ;;  %v207_v1 = vadd.f32 %v206_v61, %v53_v23  ;;  %v155_v2 = vpop.f32.mrb[5].mxu0  ;;  %v208_v3 = vpop.f32.mrb[5].mxu1 }
  0xe6   :  { %v280_v4 = vadd.f32 %v260_v58, %v256_v56  ;;  %v298_v5 = vadd.f32 %v262_v59, %v258_v57  ;;  %v156_v6 = vadd.f32 %v155_v2, %v53_v23  ;;  %v209_v7 = vadd.f32 %v208_v3, %v53_v23  ;;  %v157_v8 = vpop.f32.mrb[6].mxu0  ;;  %v210_v9 = vpop.f32.mrb[6].mxu1 }
  0xe7   :  { %v223_v10 = vmax.f32 %v154_v0, 0.0  ;;  %v225_v11 = vmax.f32 %v207_v1, 0.0  ;;  %v158_v12 = vadd.f32 %v157_v8, %v58_v25  ;;  %v211_v13 = vadd.f32 %v210_v9, %v58_v25  ;;  %v159_v14 = vpop.f32.mrb[7].mxu0  ;;  %v212_v15 = vpop.f32.mrb[7].mxu1 }
  0xe8   :  { %v224_v17 = vmax.f32 %v156_v6, 0.0  ;;  %v226_v18 = vmax.f32 %v209_v7, 0.0  ;;  %v160_v19 = vadd.f32 %v159_v14, %v58_v25  ;;  %v213_v20 = vadd.f32 %v212_v15, %v58_v25 }
  0xe9   :  { %v263_v21 = vmul.f32 %v248_v16, %v223_v10  ;;  %v265_v22 = vmul.f32 %v248_v16, %v225_v11  ;;  %v227_v24 = vmax.f32 %v158_v12, 0.0  ;;  %v229_v26 = vmax.f32 %v211_v13, 0.0 }
  0xea   :  { %v264_v28 = vmul.f32 %v248_v16, %v224_v17  ;;  %v266_v23 = vmul.f32 %v248_v16, %v226_v18  ;;  %v228_v29 = vmax.f32 %v160_v19, 0.0  ;;  %v230_v30 = vmax.f32 %v213_v20, 0.0 }
  0xeb   :  { %v272_v31 = vadd.f32 %v271_v62, %v263_v21  ;;  %v290_v32 = vadd.f32 %v289_v63, %v265_v22  ;;  %v267_v33 = vmul.f32 %v253_v27, %v227_v24  ;;  %v269_v34 = vmul.f32 %v253_v27, %v229_v26 }
  0xec   :  { %v281_v35 = vadd.f32 %v280_v4, %v264_v28  ;;  %v299_v36 = vadd.f32 %v298_v5, %v266_v23  ;;  %v268_v37 = vmul.f32 %v253_v27, %v228_v29  ;;  %v270_v38 = vmul.f32 %v253_v27, %v230_v30 }
  0xed   :  { %v273_v39 = vadd.f32 %v272_v31, %v267_v33  ;;  %v291_v40 = vadd.f32 %v290_v32, %v269_v34  ;;  %v308_v60 = vstv %s712_s5  ;;  %v346_v22 = vlaneseq }
  0xee   :  { %v282_v25 = vadd.f32 %v281_v35, %v268_v37  ;;  %v300_v41 = vadd.f32 %v299_v36, %v270_v38  ;;  %v31_v37 = vld [vmem:[%s713_s1] sm:$0xf] }
  0xef   :  { %v274_v42 = vrot.slane %v273_v39, 4  ;;  %v292_v43 = vrot.slane %v291_v40, 4  ;;  %v347_v23 = vshrl.u32 %v346_v22, 7  ;;  %vm368_vm7 = vcmp.lt.s32.totalorder %v346_v22, 512 }
  0xf0   :  { %v283_v44 = vrot.slane %v282_v25, 4  ;;  %v301_v45 = vrot.slane %v300_v41, 4 }
  0xf1   :  { %v275_v46 = vadd.f32 %v274_v42, %v273_v39  ;;  %v293_v47 = vadd.f32 %v292_v43, %v291_v40  ;;  %v378_v34 = vsub.s32 0, %v347_v23  ;;  %v559_v39 = vmov 1966171168  }
  0xf2   :  { %v284_v48 = vadd.f32 %v283_v44, %v282_v25  ;;  %v302_v49 = vadd.f32 %v301_v45, %v300_v41  ;;  %v344_v40 = vunpack.c.l.s4 %v559_v39  ;;  %v386_v43 = vsub.s32 2, %v347_v23 }
  0xf3   :  { %v276_v50 = vrot.slane %v275_v46, 2  ;;  %v294_v51 = vrot.slane %v293_v47, 2  ;;  %v379_v42 = vrot.slane %v31_v37, %v378_v34 }
  0xf4   :  { %v285_v52 = vrot.slane %v284_v48, 2  ;;  %v303_v53 = vrot.slane %v302_v49, 2 }
  0xf5   :  { %v277_v54 = vadd.f32 %v276_v50, %v275_v46  ;;  %v295_v55 = vadd.f32 %v294_v51, %v293_v47  ;;  %v382_v47 = vsub.s32 1, %v347_v23 }
  0xf6   :  { %v286_v56 = vadd.f32 %v285_v52, %v284_v48  ;;  %v304_v57 = vadd.f32 %v303_v53, %v302_v49  ;;  %v345_v48 = vunpack.c.0.s8 %v344_v40  ;;  %v390_v49 = vsub.s32 3, %v347_v23 }
  0xf7   :  { %v278_v58 = vrot.slane %v277_v54, 1  ;;  %v296_v59 = vrot.slane %v295_v55, 1 }
  0xf8   :  { %v287_v61 = vrot.slane %v286_v56, 1  ;;  %v305_v62 = vrot.slane %v304_v57, 1 }
  0xf9   :  { %v279_v63 = vadd.f32 %v278_v58, %v277_v54  ;;  %v297_v0 = vadd.f32 %v296_v59, %v295_v55  ;;  %v387_v55 = vrot.slane %v31_v37, %v386_v43 }
  0xfa   :  { %v288_v1 = vadd.f32 %v287_v61, %v286_v56  ;;  %v306_v2 = vadd.f32 %v305_v62, %v304_v57  ;;  %v383_v61 = vrot.slane %v31_v37, %v382_v47  ;;  %v391_v62 = vrot.slane %v31_v37, %v390_v49 }
  0xfb   :  { %v649_v3 = vadd.f32 %v308_v60, %v279_v63  ;;  %v651_v4 = vadd.f32 %v308_v60, %v297_v0 }
  0xfc   :  { %v653_v5 = vadd.f32 %v308_v60, %v288_v1  ;;  %v659_v10 = vadd.f32 %v308_v60, %v306_v2  ;;  %v348_v60 = vsub.s32 %v345_v48, %v347_v23 }
  0xfd   :  { %v508_v6 = vmul.f32 -1.442695, %v649_v3  ;;  %v404_v7 = vand.u32 2147483647, %v649_v3  ;;  %v510_v8 = vmul.f32 -1.442695, %v651_v4  ;;  %v396_v54 = vmul.f32 %v379_v42, %v649_v3 }
  0xfe   :  { %v406_v9 = vand.u32 2147483647, %v651_v4  ;;  %v509_v12 = vmul.f32 -1.442695, %v653_v5  ;;  %v405_v15 = vand.u32 2147483647, %v653_v5 }
  0xff   :  { %525 = vpow2.f32 %v508_v6  ;;  %v408_v11 = vsub.f32 0.0, %v404_v7  ;;  %v511_v17 = vmul.f32 -1.442695, %v659_v10  ;;  %v407_v19 = vand.u32 2147483647, %v659_v10 }
 0x100   :  { %527 = vpow2.f32 %v510_v8  ;;  %v410_v13 = vsub.f32 0.0, %v406_v9  ;;  %v409_v18 = vsub.f32 0.0, %v405_v15  ;;  %v371_v53 = vmax.f32 %v649_v3, 0.0 }
 0x101   :  { %v412_v14 = vmul.f32 1.442695, %v408_v11  ;;  %529 = vpow2.f32 %v509_v12  ;;  %v411_v21 = vsub.f32 0.0, %v407_v19  ;;  %v373_v0 = vmax.f32 %v651_v4, 0.0 }
 0x102   :  { %v416_v16 = vmul.f32 1.442695, %v410_v13  ;;  %v414_v20 = vmul.f32 1.442695, %v409_v18  ;;  %v400_v8 = vsub.f32 %v371_v53, %v396_v54  ;;  %v398_v3 = vmul.f32 %v387_v55, %v651_v4 }
 0x103   :  { %531 = vpow2.f32 %v412_v14  ;;  %v418_v24 = vmul.f32 1.442695, %v411_v21  ;;  %v372_v11 = vmax.f32 %v653_v5, 0.0  ;;  %v397_v19 = vmul.f32 %v383_v61, %v653_v5 }
 0x104   :  { %533 = vpow2.f32 %v416_v16  ;;  %v374_v16 = vmax.f32 %v659_v10, 0.0  ;;  %v402_v5 = vsub.f32 %v373_v0, %v398_v3 }
 0x105   :  { %535 = vpow2.f32 %v511_v17  ;;  %v401_v37 = vsub.f32 %v372_v11, %v397_v19 }
 0x106   :  { %537 = vpow2.f32 %v414_v20 }
 0x107   :  { %539 = vpow2.f32 %v418_v24 }
 0x109   :  { %v526_v26 = vpop.eup %525 }
 0x10a   :  { %v528_v27 = vpop.eup %527  ;;  %v325_v28 = vadd.f32 1.0, %v526_v26  ;;  %v399_v26 = vmul.f32 %v391_v62, %v659_v10 }
 0x10b   :  { %v530_v29 = vpop.eup %529  ;;  %v327_v30 = vadd.f32 1.0, %v528_v27 }
 0x10c   :  { %541 = vrcp.f32 %v325_v28  ;;  %v326_v31 = vadd.f32 1.0, %v530_v29  ;;  %v403_v39 = vsub.f32 %v374_v16, %v399_v26 }
 0x10d   :  { %v532_v32 = vpop.eup %531 }
 0x10e   :  { %v666_v33 = vpop.eup %533  ;;  %v420_v35 = vadd.f32 1.0, %v532_v32  ;;  %543 = vrcp.f32 %v326_v31  ;;  %v423_v46 = vmul.f32 -0.5, %v532_v32  ;;  %v426_v59 = vand.u32 2147483647, %v532_v32 }
 0x10f   :  { %v536_v36 = vpop.eup %535  ;;  %545 = vrcp.f32 %v327_v30  ;;  %v438_v38 = vadd.f32 1.0, %v666_v33  ;;  %v441_v51 = vmul.f32 -0.5, %v666_v33  ;;  %v444_v9 = vand.u32 2147483647, %v666_v33 }
 0x110   :  { %547 = vlog2.f32 %v420_v35  ;;  %v328_v25 = vadd.f32 1.0, %v536_v36  ;;  %v538_v41 = vpop.eup %537  ;;  %v424_v56 = vadd.f32 1.0, %v423_v46  ;;  %vm684_vm3 = vcmp.lt.f32.partialorder %v426_v59, 0.0004427343 }
 0x111   :  { %549 = vlog2.f32 %v438_v38  ;;  %v429_v44 = vadd.f32 1.0, %v538_v41  ;;  %v672_v45 = vpop.eup %539  ;;  %v432_v57 = vmul.f32 -0.5, %v538_v41  ;;  %v442_v1 = vadd.f32 1.0, %v441_v51 }
 0x112   :  { %551 = vrcp.f32 %v328_v25  ;;  %v447_v50 = vadd.f32 1.0, %v672_v45  ;;  %v450_v6 = vmul.f32 -0.5, %v672_v45  ;;  %v425_v14 = vmul.f32 %v532_v32, %v424_v56 }
 0x113   :  { %553 = vlog2.f32 %v429_v44  ;;  %v433_v15 = vadd.f32 1.0, %v432_v57  ;;  %v435_v20 = vand.u32 2147483647, %v538_v41  ;;  %v443_v24 = vmul.f32 %v666_v33, %v442_v1 }
 0x114   :  { %555 = vlog2.f32 %v447_v50  ;;  %v451_v27 = vadd.f32 1.0, %v450_v6  ;;  %vm693_vm4 = vcmp.lt.f32.partialorder %v444_v9, 0.0004427343  ;;  %v453_v31 = vand.u32 2147483647, %v672_v45 }
 0x115   :  { %v434_v35 = vmul.f32 %v538_v41, %v433_v15  ;;  %vm436_vm5 = vcmp.lt.f32.partialorder %v435_v20, 0.0004427343 }
 0x116   :  { %v542_v52 = vpop.eup %541  ;;  %v452_v25 = vmul.f32 %v672_v45, %v451_v27  ;;  %vm454_vm6 = vcmp.lt.f32.partialorder %v453_v31, 0.0004427343 }
 0x118   :  { %v544_v58 = vpop.eup %543 }
 0x119   :  { %v546_v63 = vpop.eup %545  ;;  %v341_v2 = vcombine.low %v542_v52, %v544_v58 }
 0x11a   :  { %v548_v7 = vpop.eup %547 }
 0x11b   :  { %v550_v12 = vpop.eup %549  ;;  %v422_v13 = vmul.f32 0.6931472, %v548_v7  ;;  %v349_v29 = vrot.slane %v341_v2, %v348_v60 }
 0x11c   :  { %v440_v18 = vmul.f32 0.6931472, %v550_v12  ;;  %v552_v21 = vpop.eup %551 }
 0x11d   :  { %v428_v4 = vsel %vm684_vm3, %v425_v14, %v422_v13  ;;  %v554_v28 = vpop.eup %553  ;;  %v342_v30 = vcombine.low %v546_v63, %v552_v21 }
 0x11e   :  { %v446_v32 = vsel %vm693_vm4, %v443_v24, %v440_v18  ;;  %v431_v34 = vmul.f32 0.6931472, %v554_v28  ;;  %v556_v36 = vpop.eup %555  ;;  %v456_v33 = vadd.f32 %v428_v4, %v400_v8 }
 0x11f   :  { %v356_v10 = vrot.slane %v342_v30, %v348_v60  ;;  %v449_v40 = vmul.f32 0.6931472, %v556_v36  ;;  %v458_v42 = vadd.f32 %v446_v32, %v402_v5 }
 0x120   :  { %v437_v38 = vsel %vm436_vm5, %v434_v35, %v431_v34 }
 0x121   :  { %v457_v43 = vadd.f32 %v437_v38, %v401_v37  ;;  %v357_v44 = vcombine.low %v349_v29, %v356_v10  ;;  %v455_v46 = vsel %vm454_vm6, %v452_v25, %v449_v40 }
 0x122   :  { %v459_v41 = vadd.f32 %v455_v46, %v403_v39 }
 0x123   :  { %v464_v47 = vcombine.low %v456_v33, %v457_v43  ;;  %v364_v48 = vrot.slane %v357_v44, %v348_v60 }
 0x124   :  { %v465_v50 = vcombine.low %v458_v42, %v459_v41 }
 0x125   :  { %v472_v49 = vrot.slane %v464_v47, %v348_v60  ;;  %370 = vst.msk [vmem:[%s714_s6] sm:$0xf] %vm368_vm7, %v364_v48 }
 0x126   :  { %v479_v51 = vrot.slane %v465_v50, %v348_v60 }
 0x128   :  { %v480_v52 = vcombine.low %v472_v49, %v479_v51 }
 0x12a   :  { %v487_v53 = vrot.slane %v480_v52, %v348_v60 }
 0x12c   :  { %489 = vst.msk [vmem:[%s715_s7] sm:$0xf] %vm368_vm7, %v487_v53 }

</bundles_post_ra>
